<compile_context>
chip_gen: v7x
topology: tpu7x:2x2x1
jax: 0.10.0
libtpu: 0.0.40
codegen_flags: <defaults>
</compile_context>

<pallas_src>
import functools
import math

import jax
import jax.numpy as jnp
import numpy as np
from jax import lax
from jax.experimental import pallas as pl
from jax.experimental.pallas import tpu as pltpu


# ----------------------------------------------------------------------------------
# Bounded-range sin/cos with a single shared range reduction.
# Cody-Waite 3-part pi/2 split: the leading part has only 8 mantissa bits, so k*_PIO2_HI
# is exact for k < 2**16 (positional-encoding arguments are <= max(H, W) * 2*pi).
# ----------------------------------------------------------------------------------
_TWO_OVER_PI = 0.6366197723675814
_PIO2_HI = 1.5703125
_PIO2_MID = 4.837512969970703125e-4
_PIO2_LO = 7.549789948768648e-8
# Cephes single-precision minimax polynomials on [-pi/4, pi/4].
_S1, _S2, _S3 = -1.6666654611e-1, 8.3321608736e-3, -1.9515295891e-4
_C1, _C2, _C3 = 4.166664568298827e-2, -1.388731625493765e-3, 2.443315711809948e-5


def _sincos(a):
    """(sin(a), cos(a)), ~1e-7 abs error for |a| << 2**16, one shared reduction."""
    kf = jnp.floor(a * _TWO_OVER_PI + 0.5)          # nearest multiple of pi/2
    ki = kf.astype(jnp.int32)
    r = a - kf * _PIO2_HI
    r = r - kf * _PIO2_MID
    r = r - kf * _PIO2_LO
    z = r * r
    s = ((_S3 * z + _S2) * z + _S1) * z * r + r                 # sin(r)
    c = ((_C3 * z + _C2) * z + _C1) * z * z - 0.5 * z + 1.0     # cos(r)
    q = ki & 3
    swap = (q & 1) == 1                      # quadrants 1, 3: sin <-> cos
    sin_neg = q >= 2                         # quadrants 2, 3: sin negated
    cos_neg = jnp.logical_xor(swap, sin_neg)  # quadrants 1, 2: cos negated
    sin_a = jnp.where(swap, c, s)
    sin_a = jnp.where(sin_neg, -sin_a, sin_a)
    cos_a = jnp.where(swap, s, c)
    cos_a = jnp.where(cos_neg, -cos_a, cos_a)
    return sin_a, cos_a


def _pos_embed_kernel(y_ref, x_ref, invf_ref, out_ref, *, num_pos_feats):
    # y_ref/x_ref block: (1, 1, tN) f32 ; invf_ref: (F/2, 1) f32 ; out block: (1, 2F, tN)
    F = num_pos_feats
    Fh = F // 2
    inv_freq = invf_ref[...]                 # (Fh, 1) = 1 / dim_t for each channel pair
    y = y_ref[0]                             # (1, tN)
    x = x_ref[0]                             # (1, tN)

    # One argument / range reduction / polynomial pair per *channel pair*.
    s_y, c_y = _sincos(y * inv_freq)         # (Fh, tN) each
    s_x, c_x = _sincos(x * inv_freq)

    # Interleave (sin, cos) pairs along the channel (sublane) dim with 0/1 expansion
    # matrices on the otherwise-idle MXU: out row 2k <- sin_k, row 2k+1 <- cos_k.
    # Keeps stores dense/unmasked and adds no VPU work.
    row = lax.broadcasted_iota(jnp.int32, (F, Fh), 0)
    col = lax.broadcasted_iota(jnp.int32, (F, Fh), 1)
    e_sin = (row == 2 * col).astype(jnp.float32)
    e_cos = (row == 2 * col + 1).astype(jnp.float32)

    pos_y = (jnp.dot(e_sin, s_y, preferred_element_type=jnp.float32)
             + jnp.dot(e_cos, c_y, preferred_element_type=jnp.float32))
    pos_x = (jnp.dot(e_sin, s_x, preferred_element_type=jnp.float32)
             + jnp.dot(e_cos, c_x, preferred_element_type=jnp.float32))

    out_ref[0, :F] = pos_y.astype(out_ref.dtype)   # pos_y half (channels [0, F))
    out_ref[0, F:] = pos_x.astype(out_ref.dtype)   # pos_x half (channels [F, 2F))


def _pick_tile(N, F2, b_eff, *, budget_bytes=4 << 20, min_parallel=4):
    """Spatial tile (lanes): multiple of 128, output block <= budget, and enough grid
    steps that both v7x TensorCores get work and store DMAs pipeline."""
    if N <= 128:
        return N                                        # full-extent block (allowed)
    t_budget = max(128, (budget_bytes // (F2 * 4)) // 128 * 128)
    want_tiles = max(1, -(-min_parallel // max(1, b_eff)))      # ceil(min_parallel/b)
    t_split = max(128, (-(-N // want_tiles) // 128) * 128)      # ~N/want_tiles
    t_cap = max(128, (N // 128) * 128)                          # never exceed ~N
    return min(t_budget, t_split, t_cap)


def position_embedding_sine(x, mask=None, *, num_pos_feats=64, temperature=10000,
                            normalize=False, scale=None, out_dtype=jnp.float32):
    """Matches PositionEmbeddingSine.forward. Returns (B, 2*num_pos_feats, H, W)."""
    if scale is not None and normalize is False:
        raise ValueError("normalize should be True if scale is passed")
    if scale is None:
        scale = 2 * math.pi
    if num_pos_feats % 2 != 0:
        raise ValueError("num_pos_feats must be even (sin/cos channel pairs)")

    B = x.shape[0]
    H, W = x.shape[2], x.shape[3]
    F = num_pos_feats
    F2, Fh = 2 * F, F // 2
    N = H * W

    # ---- cheap (B, H, W) prologue in plain JAX: cumsums + optional normalize ---------
    if mask is None:
        # Fast path: result is identical across the batch -> compute once.
        y_embed = jnp.broadcast_to(
            jnp.arange(1, H + 1, dtype=jnp.float32)[None, :, None], (1, H, W))
        x_embed = jnp.broadcast_to(
            jnp.arange(1, W + 1, dtype=jnp.float32)[None, None, :], (1, H, W))
        b_eff = 1
    else:
        not_mask = 1.0 - mask.astype(jnp.float32)
        y_embed = jnp.cumsum(not_mask, axis=1)
        x_embed = jnp.cumsum(not_mask, axis=2)
        b_eff = B

    if normalize:
        eps = 1e-6
        y_embed = y_embed / (y_embed[:, -1:, :] + eps) * scale
        x_embed = x_embed / (x_embed[:, :, -1:] + eps) * scale

    # Flatten spatial dims (free, row-major) so the kernel's lane dim is H*W.
    y_flat = y_embed.reshape(b_eff, 1, N)
    x_flat = x_embed.reshape(b_eff, 1, N)

    # Per-pair inverse frequency 1 / T^(2k/F), computed in float64 then cast.
    k_idx = np.arange(Fh, dtype=np.float64)
    inv_freq = jnp.asarray(
        np.power(float(temperature), -2.0 * k_idx / float(F))
        .astype(np.float32).reshape(Fh, 1))

    tN = _pick_tile(N, F2, b_eff)
    n_tiles = pl.cdiv(N, tN)          # ragged last tile handled by Pallas clipping

    kernel = functools.partial(_pos_embed_kernel, num_pos_feats=F)
    out_flat = pl.pallas_call(
        kernel,
        out_shape=jax.ShapeDtypeStruct((b_eff, F2, N), out_dtype),
        grid=(b_eff, n_tiles),
        in_specs=[
            pl.BlockSpec((1, 1, tN), lambda b, n: (b, 0, n)),
            pl.BlockSpec((1, 1, tN), lambda b, n: (b, 0, n)),
            pl.BlockSpec((Fh, 1), lambda b, n: (0, 0)),
        ],
        out_specs=pl.BlockSpec((1, F2, tN), lambda b, n: (b, 0, n)),
        compiler_params=pltpu.CompilerParams(
            dimension_semantics=("parallel", "parallel"),
            vmem_limit_bytes=48 << 20),
    )(y_flat, x_flat, inv_freq)

    # Free (no data movement) reshape back to NCHW.
    out = out_flat.reshape(b_eff, F2, H, W)
    if b_eff != B:
        # mask=None fast path: identical across batch. Free if it fuses into the
        # consumer; callers that force materialization pay B x HBM writes.
        out = jnp.broadcast_to(out, (B, F2, H, W))
    return out


def _reference(x, mask=None, *, num_pos_feats=64, temperature=10000,
               normalize=False, scale=None):
    """Pure-JAX transcription of the PyTorch forward for checking."""
    if scale is None:
        scale = 2 * math.pi
    B, _, H, W = x.shape
    if mask is None:
        mask = jnp.zeros((B, H, W), dtype=bool)
    not_mask = (~mask).astype(jnp.float32)
    y_embed = jnp.cumsum(not_mask, axis=1)
    x_embed = jnp.cumsum(not_mask, axis=2)
    if normalize:
        eps = 1e-6
        y_embed = y_embed / (y_embed[:, -1:, :] + eps) * scale
        x_embed = x_embed / (x_embed[:, :, -1:] + eps) * scale
    dim_t = jnp.arange(num_pos_feats, dtype=jnp.float32)
    dim_t = temperature ** (2 * jnp.floor(dim_t / 2) / num_pos_feats)
    pos_x = x_embed[..., None] / dim_t
    pos_y = y_embed[..., None] / dim_t
    pos_x = jnp.stack((jnp.sin(pos_x[..., 0::2]), jnp.cos(pos_x[..., 1::2])),
                      axis=4).reshape(B, H, W, num_pos_feats)
    pos_y = jnp.stack((jnp.sin(pos_y[..., 0::2]), jnp.cos(pos_y[..., 1::2])),
                      axis=4).reshape(B, H, W, num_pos_feats)
    pos = jnp.concatenate((pos_y, pos_x), axis=3).transpose(0, 3, 1, 2)
    return pos


if __name__ == "__main__":
    key = jax.random.PRNGKey(0)
    B, C, H, W = 2, 4, 16, 16
    num_pos_feats = 64
    x = jax.random.normal(key, (B, C, H, W), dtype=jnp.float32)

    # Path 1: default usage (mask=None, normalize=False).
    pos = jax.block_until_ready(
        position_embedding_sine(x, mask=None, num_pos_feats=num_pos_feats))
    ref = _reference(x, mask=None, num_pos_feats=num_pos_feats)
    assert pos.shape == (B, 2 * num_pos_feats, H, W), pos.shape
    assert pos.dtype == jnp.float32
    assert jnp.allclose(pos, ref, atol=3e-5, rtol=3e-5), "mismatch (mask=None)"

    # Path 2: real padding mask + normalize=True.
    mask = jnp.zeros((B, H, W), dtype=bool)
    mask = mask.at[0, :, 10:].set(True).at[1, 12:, :].set(True)
    pos2 = jax.block_until_ready(
        position_embedding_sine(x, mask=mask, num_pos_feats=num_pos_feats,
                                normalize=True))
    ref2 = _reference(x, mask=mask, num_pos_feats=num_pos_feats, normalize=True)
    assert jnp.allclose(pos2, ref2, atol=3e-5, rtol=3e-5), "mismatch (mask+normalize)"

    # Path 3: H*W not a multiple of 128 (exercises the ragged last spatial tile).
    x3 = jax.random.normal(jax.random.PRNGKey(1), (1, C, 12, 18), dtype=jnp.float32)
    pos3 = jax.block_until_ready(
        position_embedding_sine(x3, mask=None, num_pos_feats=num_pos_feats))
    ref3 = _reference(x3, mask=None, num_pos_feats=num_pos_feats)
    assert jnp.allclose(pos3, ref3, atol=3e-5, rtol=3e-5), "mismatch (ragged tile)"

    print("KERNEL_OK")
</pallas_src>

<mosaic_0001>
module attributes {stable_mosaic.version = 11 : i64} {
  func.func @_pos_embed_kernel(%arg0: i32, %arg1: i32, %arg2: memref<1x1x128xf32, #tpu.memory_space<vmem>>, %arg3: memref<1x1x128xf32, #tpu.memory_space<vmem>>, %arg4: memref<32x1xf32, #tpu.memory_space<vmem>>, %arg5: memref<1x128x128xf32, #tpu.memory_space<vmem>>) attributes {dimension_semantics = [#tpu.dimension_semantics<parallel>, #tpu.dimension_semantics<parallel>], iteration_bounds = array<i64: 1, 2>, scalar_prefetch = 0 : i64, scratch_operands = 0 : i64, tpu.core_type = #tpu.core_type<tc>, window_params = [{transform_indices = @transform_0, window_bounds = array<i64: 1, 1, 128>}, {transform_indices = @transform_1, window_bounds = array<i64: 1, 1, 128>}, {pipeline_mode = #tpu.pipeline_mode<synchronous>, transform_indices = @transform_2, window_bounds = array<i64: 32, 1>}, {transform_indices = @transform_3, window_bounds = array<i64: 1, 128, 128>}]} {
    %c0 = arith.constant 0 : index
    %c0_0 = arith.constant 0 : index
    %0 = vector.load %arg4[%c0, %c0_0] : memref<32x1xf32, #tpu.memory_space<vmem>>, vector<32x1xf32>
    %c0_1 = arith.constant 0 : index
    %c0_2 = arith.constant 0 : index
    %c0_3 = arith.constant 0 : index
    %1 = vector.load %arg2[%c0_1, %c0_2, %c0_3] : memref<1x1x128xf32, #tpu.memory_space<vmem>>, vector<1x1x128xf32>
    %2 = vector.shape_cast %1 : vector<1x1x128xf32> to vector<1x128xf32>
    %c0_4 = arith.constant 0 : index
    %c0_5 = arith.constant 0 : index
    %c0_6 = arith.constant 0 : index
    %3 = vector.load %arg3[%c0_4, %c0_5, %c0_6] : memref<1x1x128xf32, #tpu.memory_space<vmem>>, vector<1x1x128xf32>
    %4 = vector.shape_cast %3 : vector<1x1x128xf32> to vector<1x128xf32>
    %5 = vector.broadcast %2 : vector<1x128xf32> to vector<32x128xf32>
    %6 = vector.broadcast %0 : vector<32x1xf32> to vector<32x128xf32>
    %7 = arith.mulf %5, %6 : vector<32x128xf32>
    %cst = arith.constant 0.636619746 : f32
    %8 = vector.broadcast %cst : f32 to vector<32x128xf32>
    %9 = arith.mulf %7, %8 : vector<32x128xf32>
    %cst_7 = arith.constant 5.000000e-01 : f32
    %10 = vector.broadcast %cst_7 : f32 to vector<32x128xf32>
    %11 = arith.addf %9, %10 : vector<32x128xf32>
    %12 = math.floor %11 : vector<32x128xf32>
    %13 = arith.fptosi %12 : vector<32x128xf32> to vector<32x128xi32>
    %cst_8 = arith.constant 1.5703125 : f32
    %14 = vector.broadcast %cst_8 : f32 to vector<32x128xf32>
    %15 = arith.mulf %12, %14 : vector<32x128xf32>
    %16 = arith.subf %7, %15 : vector<32x128xf32>
    %cst_9 = arith.constant 4.83751297E-4 : f32
    %17 = vector.broadcast %cst_9 : f32 to vector<32x128xf32>
    %18 = arith.mulf %12, %17 : vector<32x128xf32>
    %19 = arith.subf %16, %18 : vector<32x128xf32>
    %cst_10 = arith.constant 7.549790e-08 : f32
    %20 = vector.broadcast %cst_10 : f32 to vector<32x128xf32>
    %21 = arith.mulf %12, %20 : vector<32x128xf32>
    %22 = arith.subf %19, %21 : vector<32x128xf32>
    %23 = arith.mulf %22, %22 : vector<32x128xf32>
    %cst_11 = arith.constant -1.95152956E-4 : f32
    %24 = vector.broadcast %cst_11 : f32 to vector<32x128xf32>
    %25 = arith.mulf %24, %23 : vector<32x128xf32>
    %cst_12 = arith.constant 0.00833216123 : f32
    %26 = vector.broadcast %cst_12 : f32 to vector<32x128xf32>
    %27 = arith.addf %25, %26 : vector<32x128xf32>
    %28 = arith.mulf %27, %23 : vector<32x128xf32>
    %cst_13 = arith.constant -0.166666552 : f32
    %29 = vector.broadcast %cst_13 : f32 to vector<32x128xf32>
    %30 = arith.addf %28, %29 : vector<32x128xf32>
    %31 = arith.mulf %30, %23 : vector<32x128xf32>
    %32 = arith.mulf %31, %22 : vector<32x128xf32>
    %33 = arith.addf %32, %22 : vector<32x128xf32>
    %cst_14 = arith.constant 2.44331568E-5 : f32
    %34 = vector.broadcast %cst_14 : f32 to vector<32x128xf32>
    %35 = arith.mulf %34, %23 : vector<32x128xf32>
    %cst_15 = arith.constant -0.00138873165 : f32
    %36 = vector.broadcast %cst_15 : f32 to vector<32x128xf32>
    %37 = arith.addf %35, %36 : vector<32x128xf32>
    %38 = arith.mulf %37, %23 : vector<32x128xf32>
    %cst_16 = arith.constant 0.0416666456 : f32
    %39 = vector.broadcast %cst_16 : f32 to vector<32x128xf32>
    %40 = arith.addf %38, %39 : vector<32x128xf32>
    %41 = arith.mulf %40, %23 : vector<32x128xf32>
    %42 = arith.mulf %41, %23 : vector<32x128xf32>
    %cst_17 = arith.constant 5.000000e-01 : f32
    %43 = vector.broadcast %cst_17 : f32 to vector<32x128xf32>
    %44 = arith.mulf %43, %23 : vector<32x128xf32>
    %45 = arith.subf %42, %44 : vector<32x128xf32>
    %cst_18 = arith.constant 1.000000e+00 : f32
    %46 = vector.broadcast %cst_18 : f32 to vector<32x128xf32>
    %47 = arith.addf %45, %46 : vector<32x128xf32>
    %c3_i32 = arith.constant 3 : i32
    %48 = vector.broadcast %c3_i32 : i32 to vector<32x128xi32>
    %49 = arith.andi %13, %48 : vector<32x128xi32>
    %c1_i32 = arith.constant 1 : i32
    %50 = vector.broadcast %c1_i32 : i32 to vector<32x128xi32>
    %51 = arith.andi %49, %50 : vector<32x128xi32>
    %c1_i32_19 = arith.constant 1 : i32
    %52 = vector.broadcast %c1_i32_19 : i32 to vector<32x128xi32>
    %53 = arith.cmpi eq, %51, %52 : vector<32x128xi32>
    %c2_i32 = arith.constant 2 : i32
    %54 = vector.broadcast %c2_i32 : i32 to vector<32x128xi32>
    %55 = arith.cmpi sge, %49, %54 : vector<32x128xi32>
    %56 = arith.xori %53, %55 : vector<32x128xi1>
    %57 = arith.select %53, %47, %33 : vector<32x128xi1>, vector<32x128xf32>
    %cst_20 = arith.constant 0.000000e+00 : f32
    %58 = vector.broadcast %cst_20 : f32 to vector<32x128xf32>
    %59 = arith.subf %58, %57 : vector<32x128xf32>
    %60 = arith.select %55, %59, %57 : vector<32x128xi1>, vector<32x128xf32>
    %61 = arith.select %53, %33, %47 : vector<32x128xi1>, vector<32x128xf32>
    %cst_21 = arith.constant 0.000000e+00 : f32
    %62 = vector.broadcast %cst_21 : f32 to vector<32x128xf32>
    %63 = arith.subf %62, %61 : vector<32x128xf32>
    %64 = arith.select %56, %63, %61 : vector<32x128xi1>, vector<32x128xf32>
    %65 = vector.broadcast %4 : vector<1x128xf32> to vector<32x128xf32>
    %66 = vector.broadcast %0 : vector<32x1xf32> to vector<32x128xf32>
    %67 = arith.mulf %65, %66 : vector<32x128xf32>
    %cst_22 = arith.constant 0.636619746 : f32
    %68 = vector.broadcast %cst_22 : f32 to vector<32x128xf32>
    %69 = arith.mulf %67, %68 : vector<32x128xf32>
    %cst_23 = arith.constant 5.000000e-01 : f32
    %70 = vector.broadcast %cst_23 : f32 to vector<32x128xf32>
    %71 = arith.addf %69, %70 : vector<32x128xf32>
    %72 = math.floor %71 : vector<32x128xf32>
    %73 = arith.fptosi %72 : vector<32x128xf32> to vector<32x128xi32>
    %cst_24 = arith.constant 1.5703125 : f32
    %74 = vector.broadcast %cst_24 : f32 to vector<32x128xf32>
    %75 = arith.mulf %72, %74 : vector<32x128xf32>
    %76 = arith.subf %67, %75 : vector<32x128xf32>
    %cst_25 = arith.constant 4.83751297E-4 : f32
    %77 = vector.broadcast %cst_25 : f32 to vector<32x128xf32>
    %78 = arith.mulf %72, %77 : vector<32x128xf32>
    %79 = arith.subf %76, %78 : vector<32x128xf32>
    %cst_26 = arith.constant 7.549790e-08 : f32
    %80 = vector.broadcast %cst_26 : f32 to vector<32x128xf32>
    %81 = arith.mulf %72, %80 : vector<32x128xf32>
    %82 = arith.subf %79, %81 : vector<32x128xf32>
    %83 = arith.mulf %82, %82 : vector<32x128xf32>
    %cst_27 = arith.constant -1.95152956E-4 : f32
    %84 = vector.broadcast %cst_27 : f32 to vector<32x128xf32>
    %85 = arith.mulf %84, %83 : vector<32x128xf32>
    %cst_28 = arith.constant 0.00833216123 : f32
    %86 = vector.broadcast %cst_28 : f32 to vector<32x128xf32>
    %87 = arith.addf %85, %86 : vector<32x128xf32>
    %88 = arith.mulf %87, %83 : vector<32x128xf32>
    %cst_29 = arith.constant -0.166666552 : f32
    %89 = vector.broadcast %cst_29 : f32 to vector<32x128xf32>
    %90 = arith.addf %88, %89 : vector<32x128xf32>
    %91 = arith.mulf %90, %83 : vector<32x128xf32>
    %92 = arith.mulf %91, %82 : vector<32x128xf32>
    %93 = arith.addf %92, %82 : vector<32x128xf32>
    %cst_30 = arith.constant 2.44331568E-5 : f32
    %94 = vector.broadcast %cst_30 : f32 to vector<32x128xf32>
    %95 = arith.mulf %94, %83 : vector<32x128xf32>
    %cst_31 = arith.constant -0.00138873165 : f32
    %96 = vector.broadcast %cst_31 : f32 to vector<32x128xf32>
    %97 = arith.addf %95, %96 : vector<32x128xf32>
    %98 = arith.mulf %97, %83 : vector<32x128xf32>
    %cst_32 = arith.constant 0.0416666456 : f32
    %99 = vector.broadcast %cst_32 : f32 to vector<32x128xf32>
    %100 = arith.addf %98, %99 : vector<32x128xf32>
    %101 = arith.mulf %100, %83 : vector<32x128xf32>
    %102 = arith.mulf %101, %83 : vector<32x128xf32>
    %cst_33 = arith.constant 5.000000e-01 : f32
    %103 = vector.broadcast %cst_33 : f32 to vector<32x128xf32>
    %104 = arith.mulf %103, %83 : vector<32x128xf32>
    %105 = arith.subf %102, %104 : vector<32x128xf32>
    %cst_34 = arith.constant 1.000000e+00 : f32
    %106 = vector.broadcast %cst_34 : f32 to vector<32x128xf32>
    %107 = arith.addf %105, %106 : vector<32x128xf32>
    %c3_i32_35 = arith.constant 3 : i32
    %108 = vector.broadcast %c3_i32_35 : i32 to vector<32x128xi32>
    %109 = arith.andi %73, %108 : vector<32x128xi32>
    %c1_i32_36 = arith.constant 1 : i32
    %110 = vector.broadcast %c1_i32_36 : i32 to vector<32x128xi32>
    %111 = arith.andi %109, %110 : vector<32x128xi32>
    %c1_i32_37 = arith.constant 1 : i32
    %112 = vector.broadcast %c1_i32_37 : i32 to vector<32x128xi32>
    %113 = arith.cmpi eq, %111, %112 : vector<32x128xi32>
    %c2_i32_38 = arith.constant 2 : i32
    %114 = vector.broadcast %c2_i32_38 : i32 to vector<32x128xi32>
    %115 = arith.cmpi sge, %109, %114 : vector<32x128xi32>
    %116 = arith.xori %113, %115 : vector<32x128xi1>
    %117 = arith.select %113, %107, %93 : vector<32x128xi1>, vector<32x128xf32>
    %cst_39 = arith.constant 0.000000e+00 : f32
    %118 = vector.broadcast %cst_39 : f32 to vector<32x128xf32>
    %119 = arith.subf %118, %117 : vector<32x128xf32>
    %120 = arith.select %115, %119, %117 : vector<32x128xi1>, vector<32x128xf32>
    %121 = arith.select %113, %93, %107 : vector<32x128xi1>, vector<32x128xf32>
    %cst_40 = arith.constant 0.000000e+00 : f32
    %122 = vector.broadcast %cst_40 : f32 to vector<32x128xf32>
    %123 = arith.subf %122, %121 : vector<32x128xf32>
    %124 = arith.select %116, %123, %121 : vector<32x128xi1>, vector<32x128xf32>
    %125 = tpu.iota {dimensions = array<i32: 0>} : vector<64x32xi32>
    %126 = tpu.iota {dimensions = array<i32: 1>} : vector<64x32xi32>
    %c2_i32_41 = arith.constant 2 : i32
    %127 = vector.broadcast %c2_i32_41 : i32 to vector<64x32xi32>
    %128 = arith.muli %127, %126 : vector<64x32xi32>
    %129 = arith.cmpi eq, %125, %128 : vector<64x32xi32>
    %130 = arith.extui %129 : vector<64x32xi1> to vector<64x32xi32>
    %131 = arith.sitofp %130 : vector<64x32xi32> to vector<64x32xf32>
    %c2_i32_42 = arith.constant 2 : i32
    %132 = vector.broadcast %c2_i32_42 : i32 to vector<64x32xi32>
    %133 = arith.muli %132, %126 : vector<64x32xi32>
    %c1_i32_43 = arith.constant 1 : i32
    %134 = vector.broadcast %c1_i32_43 : i32 to vector<64x32xi32>
    %135 = arith.addi %133, %134 : vector<64x32xi32>
    %136 = arith.cmpi eq, %125, %135 : vector<64x32xi32>
    %137 = arith.extui %136 : vector<64x32xi1> to vector<64x32xi32>
    %138 = arith.sitofp %137 : vector<64x32xi32> to vector<64x32xf32>
    %cst_44 = arith.constant dense<0.000000e+00> : vector<64x128xf32>
    %139 = tpu.matmul %131, %60, %cst_44 {dimension_numbers = #tpu.dot_dimension_numbers<[1], [0], [0], [1], [0, 0, 1, 1], [], []>} : vector<64x32xf32>, vector<32x128xf32>, vector<64x128xf32> -> vector<64x128xf32>
    %cst_45 = arith.constant dense<0.000000e+00> : vector<64x128xf32>
    %140 = tpu.matmul %138, %64, %cst_45 {dimension_numbers = #tpu.dot_dimension_numbers<[1], [0], [0], [1], [0, 0, 1, 1], [], []>} : vector<64x32xf32>, vector<32x128xf32>, vector<64x128xf32> -> vector<64x128xf32>
    %141 = arith.addf %139, %140 : vector<64x128xf32>
    %cst_46 = arith.constant dense<0.000000e+00> : vector<64x128xf32>
    %142 = tpu.matmul %131, %120, %cst_46 {dimension_numbers = #tpu.dot_dimension_numbers<[1], [0], [0], [1], [0, 0, 1, 1], [], []>} : vector<64x32xf32>, vector<32x128xf32>, vector<64x128xf32> -> vector<64x128xf32>
    %cst_47 = arith.constant dense<0.000000e+00> : vector<64x128xf32>
    %143 = tpu.matmul %138, %124, %cst_47 {dimension_numbers = #tpu.dot_dimension_numbers<[1], [0], [0], [1], [0, 0, 1, 1], [], []>} : vector<64x32xf32>, vector<32x128xf32>, vector<64x128xf32> -> vector<64x128xf32>
    %144 = arith.addf %142, %143 : vector<64x128xf32>
    %c0_48 = arith.constant 0 : index
    %c0_49 = arith.constant 0 : index
    %c0_50 = arith.constant 0 : index
    %145 = vector.load %arg5[%c0_48, %c0_49, %c0_50] : memref<1x128x128xf32, #tpu.memory_space<vmem>>, vector<1x64x128xf32>
    %146 = vector.shape_cast %145 : vector<1x64x128xf32> to vector<64x128xf32>
    %147 = vector.shape_cast %141 : vector<64x128xf32> to vector<1x64x128xf32>
    tpu.vector_store %arg5[%c0_48, %c0_49, %c0_50], %147 {strides = array<i32>} : memref<1x128x128xf32, #tpu.memory_space<vmem>>, vector<1x64x128xf32>,
    %c0_51 = arith.constant 0 : index
    %c64 = arith.constant 64 : index
    %c0_52 = arith.constant 0 : index
    %148 = vector.load %arg5[%c0_51, %c64, %c0_52] : memref<1x128x128xf32, #tpu.memory_space<vmem>>, vector<1x64x128xf32>
    %149 = vector.shape_cast %148 : vector<1x64x128xf32> to vector<64x128xf32>
    %150 = vector.shape_cast %144 : vector<64x128xf32> to vector<1x64x128xf32>
    tpu.vector_store %arg5[%c0_51, %c64, %c0_52], %150 {strides = array<i32>} : memref<1x128x128xf32, #tpu.memory_space<vmem>>, vector<1x64x128xf32>,
    return
  }
  func.func @transform_0(%arg0: i32, %arg1: i32) -> (i32, i32, i32) {
    %c0_i32 = arith.constant 0 : i32
    %c0_i32_0 = arith.constant 0 : i32
    return %arg0, %c0_i32, %arg1 : i32, i32, i32
  }
  func.func @transform_1(%arg0: i32, %arg1: i32) -> (i32, i32, i32) {
    %c0_i32 = arith.constant 0 : i32
    %c0_i32_0 = arith.constant 0 : i32
    return %arg0, %c0_i32, %arg1 : i32, i32, i32
  }
  func.func @transform_2(%arg0: i32, %arg1: i32) -> (i32, i32) {
    %c0_i32 = arith.constant 0 : i32
    %c0_i32_0 = arith.constant 0 : i32
    %c0_i32_1 = arith.constant 0 : i32
    return %c0_i32, %c0_i32_0 : i32, i32
  }
  func.func @transform_3(%arg0: i32, %arg1: i32) -> (i32, i32, i32) {
    %c0_i32 = arith.constant 0 : i32
    %c0_i32_0 = arith.constant 0 : i32
    return %arg0, %c0_i32, %arg1 : i32, i32, i32
  }
}

</mosaic_0001>

<bundles_post_ra>
// kernel: tpu_custom_call.1
= control target key start
LH: loop header
LB: loop body
LE: loop exit
PB: predicated region body
PF: predicated region fallthrough
CT: control target
= control target key end

     0   :  { %8 = vsyncpa [#allocation3], 0  ;;  %s2220_s0 = inlined_call_operand.vmem [shape: f32[1,1,256], index: 0, kind: input, shape index: {}]   ;;  %s2221_s1 = inlined_call_operand.vmem [shape: f32[1,1,256], index: 1, kind: input, shape index: {}]   ;;  %s2222_s2 = inlined_call_operand.vmem [shape: f32[32,1], index: 2, kind: input, shape index: {}]   ;;  %s2223_s3 = inlined_call_operand.hbm [shape: f32[1,128,256], index: 3, kind: output, shape index: {}]  }
   0x1   :  { %10 = vsyncpa [#allocation3 + $0x1], 0  ;;  %s1640_s12 = smov 0   ;;  %s1642_s13 = smov 0  }
   0x2   :  { %s1644_s14 = smov 0   ;;  %s1646_s15 = smov 0  }
   0x3   :  { %s1648_s16 = smov 0   ;;  %s1650_s17 = smov 0  }
   0x4 LB: > { %s1220_s18 = sadd.s32 4294967295, %s1612_s17   ;;  %s1221_s19 = sadd.s32 4294967294, %s1612_s17   ;;  %s1612_s17 = sphi %s1650_s17, %s16_s17   ;;  %s1608_s16 = sphi %s1648_s16, %s2249_s16   ;;  %s1604_s15 = sphi %s1646_s15, %s2248_s15   ;;  %s1600_s14 = sphi %s1644_s14, %s2247_s14   ;;  %s1596_s13 = sphi %s1642_s13, %s2246_s13   ;;  %s1592_s12 = sphi %s1640_s12, %s2245_s12  }
   0x5   : > { %s25_s20 = sadd.s32 1, %s1608_s16  ;;  %s114_s21 = sadd.s32 1, %s1600_s14 }
   0x6   : > { %p26_p0 = scmp.ge.s32.totalorder %s25_s20, 2  ;;  %p124_p1 = scmp.ne.s32.totalorder %s1600_s14, %s1596_s13 }
   0x7   : > { %p125_p2 = scmp.eq.s32.totalorder %s1220_s18, 1  ;;  %p130_p3 = scmp.ne.s32.totalorder %s1596_s13, %s1592_s12 }
   0x8   : > { %s2251_s20 = smov (%p26_p0, %s25_s20), 0  ;;  %p131_p5 = scmp.eq.s32.totalorder %s1221_s19, 1 }
   0x9   : > { %p1680_p4 = por %p125_p2, %p124_p1  ;;  %s110_s23 = ssub.s32 %s1608_s16, %s2251_s20 }
   0xa   : > { %p1224_p6 = scmp.ge.s32.totalorder %s1612_s17, 1  ;;  %p112_p7 = scmp.eq.s32.totalorder %s110_s23, 0 }
   0xb   : > { %p1687_p8 = por %p131_p5, %p130_p3  ;;  %p172_p9 = scmp.lt.s32.totalorder %s1612_s17, 3 }
   0xc   : > { %s1693_s25 = scalar_select %p112_p7, %s1600_s14, %s114_s21  }
   0xd   : > { %p173_p10 = pnand %p1224_p6, %p172_p9 }
   0xf   : > { %176 = sbr.rel (%p173_p10) target bundleno = 496 (0x1f0), region = 32 }
  0x16   : > { %v221_v0 = vld [vmem:[%s2222_s2 + $0x10] sm:$0xff]  ;;  %v219_v1 = vld [vmem:[%s2222_s2] sm:$0xff]  ;;  %v1614_v2 = vmov 0   ;;  %v222_v3 = vld [vmem:[%s2222_s2 + $0x18] sm:$0xff]  ;;  %v569_v5 = vlaneseq  ;;  %vm630_vm1 = vcmask 261120   ;;  %v1615_v15 = vmov 0.0  }
  0x17   : > { %1533 = vset.pattern.permute.xlu1 %v1614_v2  ;;  %1532 = vset.pattern.permute.xlu0 %v1614_v2  ;;  %v220_v4 = vld [vmem:[%s2222_s2 + $0x8] sm:$0xff]  ;;  %p207_p11 = scmp.lt.s32.totalorder %s1604_s15, 1  ;;  %s202_s21 = sand.u32 1, %s1596_s13  }
  0x18   : > { %243 = vperm.xlu1 %1533, %v221_v0   ;;  %233 = vperm.xlu0 %1532, %v219_v1   ;;  %v570_v6 = vshrl.u32 %v569_v5, 7  ;;  %v579_v7 = vand.u32 127, %v569_v5  ;;  %s1225_s23 = sshll.u32 %s202_s21, 7  ;;  %s1277_s27 = sshll.u32 %s1604_s15, 7 }
  0x19   : > { %s208_s7 = scalar_select %p207_p11, %s1604_s15, 1 }
  0x1a   : > { %v580_v8 = vmul.u32 2, %v579_v7  ;;  %v571_v9 = vadd.s32 8, %v570_v6  ;;  %v572_v10 = vadd.s32 16, %v570_v6  ;;  %v573_v11 = vadd.s32 24, %v570_v6  ;;  %s2145_s26 = scalar_lea.vmem [#allocation2], %s1225_s23  ;;  %s2166_s4 = scalar_lea.hbm %s2223_s3, %s1277_s27 }
  0x1b   : > { %v574_v13 = vadd.s32 32, %v570_v6  ;;  %v575_v14 = vadd.s32 40, %v570_v6  ;;  %v576_v20 = vadd.s32 48, %v570_v6  ;;  %v577_v23 = vadd.s32 56, %v570_v6  ;;  %s211_s10 = scalar_lea.vmem %s2220_s0, %s208_s7  ;;  %s218_s19 = scalar_lea.vmem %s2221_s1, %s208_s7 }
  0x1c   : > { %248 = vperm.xlu1 %1533, %v222_v3   ;;  %238 = vperm.xlu0 %1532, %v220_v4   ;;  %v605_v12 = vadd.s32 1, %v580_v8  ;;  %vm582_vm0 = vcmp.eq.s32.totalorder %v571_v9, %v580_v8  ;;  %vm581_vm10 = vcmp.eq.s32.totalorder %v570_v6, %v580_v8  ;;  %vm583_vm11 = vcmp.eq.s32.totalorder %v572_v10, %v580_v8  ;;  %v1226_v34 = vld [vmem:[%s211_s10] ss:$0 sm:$0xff]  ;;  %s1130_s28 = sshll.u32 %s2145_s26, 4  ;;  %s2174_s15 = scalar_lea.sflag [#allocation3], %s202_s21  ;;  %s2168_s28 = int_to_ptr.vmem [resolvable:$true] %s1130_s28 }
  0x1d   : > { %v1723_v26 = vsel %vm581_vm10, 1.0, %v1615_v15  ;;  %v1726_v27 = vsel %vm582_vm0, 1.0, %v1615_v15  ;;  %v1728_v28 = vsel %vm583_vm11, 1.0, %v1615_v15  ;;  %vm584_vm12 = vcmp.eq.s32.totalorder %v573_v11, %v580_v8  ;;  %v1227_v35 = vld [vmem:[%s218_s19] ss:$0 sm:$0xff]  ;;  %s1534_s5 = scalar_lea.vmem %s2168_s28, 2048 }
  0x1e   : > { %vm606_vm2 = vcmp.eq.s32.totalorder %v570_v6, %v605_v12  ;;  %vm607_vm3 = vcmp.eq.s32.totalorder %v571_v9, %v605_v12  ;;  %vm608_vm4 = vcmp.eq.s32.totalorder %v572_v10, %v605_v12  ;;  %vm609_vm5 = vcmp.eq.s32.totalorder %v573_v11, %v605_v12  ;;  %p1535_p12 = scmp.ne.s32.totalorder %s2168_s28, %s1534_s5  ;;  %s1616_s6 = smov [#allocation2]  }
  0x1f   : > { %v1236_v16 = vsel %vm606_vm2, 1.0, %v1615_v15  ;;  %v1707_v17 = vsel %vm607_vm3, 1.0, %v1615_v15  ;;  %v1709_v18 = vsel %vm608_vm4, 1.0, %v1615_v15  ;;  %v1711_v19 = vsel %vm609_vm5, 1.0, %v1615_v15  ;;  %s1538_s7 = sshll.u32 %s1616_s6, 4  ;;  %s1539_s7 = int_to_ptr.vmem [resolvable:$false] %s1538_s7 }
  0x20   : > { %1336 = vmatprep.mubr.msk.f32.mxu0 %vm630_vm1, %v1236_v16  ;;  %1376 = vmatprep.mubr.msk.f32.mxu1 %vm630_vm1, %v1236_v16  ;;  %vm610_vm6 = vcmp.eq.s32.totalorder %v574_v13, %v605_v12  ;;  %vm611_vm7 = vcmp.eq.s32.totalorder %v575_v14, %v605_v12  ;;  %vm612_vm8 = vcmp.eq.s32.totalorder %v576_v20, %v605_v12  ;;  %v1730_v29 = vsel %vm584_vm12, 1.0, %v1615_v15  ;;  %p1536_p13 = pnand %p1535_p12, %p1680_p4  ;;  %s1540_s8 = scalar_lea.vmem %s1539_s7, 4096 }
  0x21   : > { %v1715_v21 = vsel %vm610_vm6, 1.0, %v1615_v15  ;;  %v1717_v22 = vsel %vm611_vm7, 1.0, %v1615_v15  ;;  %v1719_v24 = vsel %vm612_vm8, 1.0, %v1615_v15  ;;  %vm613_vm9 = vcmp.eq.s32.totalorder %v577_v23, %v605_v12  ;;  %p1541_p1 = scmp.lt.s32.totalorder %s2168_s28, %s1539_s7  ;;  %p1542_p2 = scmp.lt.s32.totalorder %s1540_s8, %s1534_s5 }
  0x22   : > { %v1721_v25 = vsel %vm613_vm9, 1.0, %v1615_v15  ;;  %vm585_vm13 = vcmp.eq.s32.totalorder %v574_v13, %v580_v8  ;;  %vm586_vm14 = vcmp.eq.s32.totalorder %v575_v14, %v580_v8  ;;  %vm587_vm15 = vcmp.eq.s32.totalorder %v576_v20, %v580_v8  ;;  %p1537_p0 = pneg %p1536_p13 }
  0x23   : > { %v1732_v30 = vsel %vm585_vm13, 1.0, %v1615_v15  ;;  %v1734_v31 = vsel %vm586_vm14, 1.0, %v1615_v15  ;;  %v1737_v32 = vsel %vm587_vm15, 1.0, %v1615_v15  ;;  %vm588_vm2 = vcmp.eq.s32.totalorder %v577_v23, %v580_v8  ;;  %p1543_p3 = por %p1542_p2, %p1541_p1 }
  0x24   : > { %v1739_v33 = vsel %vm588_vm2, 1.0, %v1615_v15 }
  0x25   : > { %2227 = vst [vmem:[#allocation5_spill] sm:$0xff] %v1739_v33  ;;  %p1544_p5 = pnand %p1543_p3, %p1537_p0 }
  0x97   : > { %v244_v36 = vpop.permute.xlu1 %243  ;;  %v234_v37 = vpop.permute.xlu0 %233 }
  0x98   : > { %v253_v38 = vmul.f32 %v1226_v34, %v244_v36  ;;  %v415_v39 = vmul.f32 %v1227_v35, %v244_v36  ;;  %v251_v40 = vmul.f32 %v1226_v34, %v234_v37  ;;  %v1748_v41 = vmul.f32 %v1227_v35, %v234_v37 }
  0x9a   : > { %v257_v42 = vmul.f32 0.63661975, %v253_v38  ;;  %v419_v43 = vmul.f32 0.63661975, %v415_v39  ;;  %v255_v44 = vmul.f32 0.63661975, %v251_v40 }
  0x9b   : > { %v417_v45 = vmul.f32 0.63661975, %v1748_v41  ;;  %v249_v46 = vpop.permute.xlu1 %248  ;;  %v239_v47 = vpop.permute.xlu0 %238 }
  0x9c   : > { %v261_v48 = vadd.f32 0.5, %v257_v42  ;;  %v423_v49 = vadd.f32 0.5, %v419_v43  ;;  %v259_v50 = vadd.f32 0.5, %v255_v44  ;;  %v254_v51 = vmul.f32 %v1226_v34, %v249_v46 }
  0x9d   : > { %v416_v52 = vmul.f32 %v1227_v35, %v249_v46  ;;  %v1751_v53 = vmul.f32 %v1226_v34, %v239_v47  ;;  %v421_v57 = vadd.f32 0.5, %v417_v45  ;;  %v1759_v59 = vmul.f32 %v1227_v35, %v239_v47 }
  0x9e   : > { %v1753_v54 = vfloor.f32 %v261_v48  ;;  %v1755_v55 = vfloor.f32 %v423_v49  ;;  %v1757_v56 = vfloor.f32 %v259_v50  ;;  %v258_v58 = vmul.f32 0.63661975, %v254_v51 }
  0x9f   : > { %v420_v63 = vmul.f32 0.63661975, %v416_v52  ;;  %v256_v2 = vmul.f32 0.63661975, %v1751_v53  ;;  %v418_v10 = vmul.f32 0.63661975, %v1759_v59  ;;  %v1771_v13 = vfloor.f32 %v421_v57 }
  0xa0   : > { %v273_v60 = vmul.f32 1.5703125, %v1753_v54  ;;  %v281_v61 = vmul.f32 0.0004837513, %v1753_v54  ;;  %v435_v62 = vmul.f32 1.5703125, %v1755_v55  ;;  %v443_v0 = vmul.f32 0.0004837513, %v1755_v55 }
  0xa1   : > { %v271_v1 = vmul.f32 1.5703125, %v1757_v56  ;;  %v289_v4 = vmul.f32 7.54979e-08, %v1753_v54  ;;  %v451_v6 = vmul.f32 7.54979e-08, %v1755_v55  ;;  %v279_v8 = vmul.f32 0.0004837513, %v1757_v56 }
  0xa2   : > { %v277_v3 = vsub.f32 %v253_v38, %v273_v60  ;;  %v439_v5 = vsub.f32 %v415_v39, %v435_v62  ;;  %v262_v9 = vadd.f32 0.5, %v258_v58  ;;  %v424_v14 = vadd.f32 0.5, %v420_v63 }
  0xa3   : > { %v275_v7 = vsub.f32 %v251_v40, %v271_v1  ;;  %v287_v16 = vmul.f32 7.54979e-08, %v1757_v56  ;;  %v260_v38 = vadd.f32 0.5, %v256_v2  ;;  %v422_v39 = vadd.f32 0.5, %v418_v10 }
  0xa4   : > { %v285_v11 = vsub.f32 %v277_v3, %v281_v61  ;;  %v447_v12 = vsub.f32 %v439_v5, %v443_v0  ;;  %v1774_v20 = vfloor.f32 %v262_v9  ;;  %v1780_v35 = vfloor.f32 %v424_v14 }
  0xa5   : > { %v283_v15 = vsub.f32 %v275_v7, %v279_v8  ;;  %v433_v43 = vmul.f32 1.5703125, %v1771_v13  ;;  %v264_v61 = vfloor.f32 %v260_v38  ;;  %v1804_v62 = vfloor.f32 %v422_v39 }
  0xa6   : > { %v1776_v23 = vsub.f32 %v285_v11, %v289_v4  ;;  %v1778_v34 = vsub.f32 %v447_v12, %v451_v6  ;;  %v274_v37 = vmul.f32 1.5703125, %v1774_v20  ;;  %v436_v44 = vmul.f32 1.5703125, %v1780_v35 }
  0xa7   : > { %v1782_v36 = vsub.f32 %v283_v15, %v287_v16  ;;  %v282_v47 = vmul.f32 0.0004837513, %v1774_v20  ;;  %v444_v57 = vmul.f32 0.0004837513, %v1780_v35  ;;  %v290_v60 = vmul.f32 7.54979e-08, %v1774_v20 }
  0xa8   : > { %v1787_v40 = vmul.f32 %v1776_v23, %v1776_v23  ;;  %v1791_v42 = vmul.f32 %v1778_v34, %v1778_v34  ;;  %v278_v46 = vsub.f32 %v254_v51, %v274_v37  ;;  %v440_v50 = vsub.f32 %v416_v52, %v436_v44 }
  0xa9   : > { %v1797_v45 = vmul.f32 %v1782_v36, %v1782_v36  ;;  %v437_v0 = vsub.f32 %v1748_v41, %v433_v43  ;;  %v452_v51 = vmul.f32 7.54979e-08, %v1780_v35  ;;  %v441_v2 = vmul.f32 0.0004837513, %v1771_v13 }
  0xaa   : > { %v301_v48 = vmul.f32 -0.00019515296, %v1787_v40  ;;  %v463_v49 = vmul.f32 -0.00019515296, %v1791_v42  ;;  %v286_v58 = vsub.f32 %v278_v46, %v282_v47  ;;  %v448_v1 = vsub.f32 %v440_v50, %v444_v57 }
  0xab   : > { %v449_v3 = vmul.f32 7.54979e-08, %v1771_v13  ;;  %v272_v52 = vmul.f32 1.5703125, %v264_v61  ;;  %v434_v7 = vmul.f32 1.5703125, %v1804_v62  ;;  %v299_v8 = vmul.f32 -0.00019515296, %v1797_v45 }
  0xac   : > { %v305_v63 = vadd.f32 0.008332161, %v301_v48  ;;  %v1810_v4 = vsub.f32 %v286_v58, %v290_v60  ;;  %v467_v5 = vadd.f32 0.008332161, %v463_v49  ;;  %v1812_v6 = vsub.f32 %v448_v1, %v452_v51 }
  0xad   : > { %v276_v10 = vsub.f32 %v1751_v53, %v272_v52  ;;  %v280_v11 = vmul.f32 0.0004837513, %v264_v61  ;;  %v445_v12 = vsub.f32 %v437_v0, %v441_v2  ;;  %v438_v15 = vsub.f32 %v1759_v59, %v434_v7 }
  0xae   : > { %v309_v9 = vmul.f32 %v305_v63, %v1787_v40  ;;  %v1819_v41 = vmul.f32 %v1810_v4, %v1810_v4  ;;  %v1824_v14 = vmul.f32 %v1812_v6, %v1812_v6  ;;  %v442_v16 = vmul.f32 0.0004837513, %v1804_v62 }
  0xaf   : > { %v284_v38 = vsub.f32 %v276_v10, %v280_v11  ;;  %v288_v39 = vmul.f32 7.54979e-08, %v264_v61  ;;  %v1456_v43 = vtrunc.f32 %v1757_v56  ;;  %v471_v44 = vmul.f32 %v467_v5, %v1791_v42 }
  0xb0   : > { %v302_v37 = vmul.f32 -0.00019515296, %v1819_v41  ;;  %v464_v53 = vmul.f32 -0.00019515296, %v1824_v14  ;;  %v446_v46 = vsub.f32 %v438_v15, %v442_v16  ;;  %v450_v47 = vmul.f32 7.54979e-08, %v1804_v62 }
  0xb1   : > { %v313_v48 = vadd.f32 -0.16666655, %v309_v9  ;;  %v1833_v50 = vsub.f32 %v284_v38, %v288_v39  ;;  %v303_v59 = vadd.f32 0.008332161, %v299_v8  ;;  %v1835_v57 = vsub.f32 %v445_v12, %v449_v3 }
  0xb2   : > { %v306_v49 = vadd.f32 0.008332161, %v302_v37  ;;  %v468_v58 = vadd.f32 0.008332161, %v464_v53  ;;  %v1837_v60 = vsub.f32 %v446_v46, %v450_v47  ;;  %v1458_v63 = vtrunc.f32 %v264_v61 }
  0xb3   : > { %v296_v0 = vmul.f32 %v1833_v50, %v1833_v50  ;;  %v307_v1 = vmul.f32 %v303_v59, %v1797_v45  ;;  %v327_v51 = vmul.f32 2.4433157e-05, %v1797_v45  ;;  %v475_v2 = vadd.f32 -0.16666655, %v471_v44 }
  0xb4   : > { %v310_v56 = vmul.f32 %v306_v49, %v1819_v41  ;;  %v472_v52 = vmul.f32 %v468_v58, %v1824_v14  ;;  %v1847_v3 = vmul.f32 %v1837_v60, %v1837_v60  ;;  %v1457_v5 = vcvt.f32.s32 %v1456_v43 }
  0xb5   : > { %v317_v7 = vmul.f32 %v313_v48, %v1787_v40  ;;  %v300_v8 = vmul.f32 -0.00019515296, %v296_v0  ;;  %v311_v9 = vadd.f32 -0.16666655, %v307_v1  ;;  %v1459_v12 = vcvt.f32.s32 %v1458_v63 }
  0xb6   : > { %v314_v61 = vadd.f32 -0.16666655, %v310_v56  ;;  %v476_v10 = vadd.f32 -0.16666655, %v472_v52  ;;  %v462_v11 = vmul.f32 -0.00019515296, %v1847_v3  ;;  %v479_v44 = vmul.f32 %v475_v2, %v1791_v42 }
  0xb7   : > { %v328_v15 = vmul.f32 2.4433157e-05, %v296_v0  ;;  %v304_v37 = vadd.f32 0.008332161, %v300_v8  ;;  %v315_v38 = vmul.f32 %v311_v9, %v1797_v45  ;;  %v331_v39 = vadd.f32 -0.0013887316, %v327_v51 }
  0xb8   : > { %v318_v16 = vmul.f32 %v314_v61, %v1819_v41  ;;  %v1856_v43 = vmul.f32 %v1835_v57, %v1835_v57  ;;  %v466_v53 = vadd.f32 0.008332161, %v462_v11  ;;  %v1859_v47 = vmul.f32 %v317_v7, %v1776_v23 }
  0xb9   : > { %v332_v46 = vadd.f32 -0.0013887316, %v328_v15  ;;  %v308_v48 = vmul.f32 %v304_v37, %v296_v0  ;;  %v335_v49 = vmul.f32 %v331_v39, %v1797_v45  ;;  %v363_v59 = vand.u32 3, %v1457_v5 }
  0xba   : > { %v322_v58 = vmul.f32 %v318_v16, %v1810_v4  ;;  %v480_v63 = vmul.f32 %v476_v10, %v1824_v14  ;;  %v470_v56 = vmul.f32 %v466_v53, %v1847_v3  ;;  %v319_v2 = vmul.f32 %v315_v38, %v1782_v36 }
  0xbb   : > { %v336_v1 = vmul.f32 %v332_v46, %v296_v0  ;;  %v312_v51 = vadd.f32 -0.16666655, %v308_v48  ;;  %v339_v52 = vadd.f32 0.041666646, %v335_v49  ;;  %v364_v61 = vand.u32 3, %v1459_v12 }
  0xbc   : > { %v1867_v8 = vmul.f32 %v479_v44, %v1778_v34  ;;  %v351_v9 = vmul.f32 0.5, %v1797_v45  ;;  %v1464_v5 = vtrunc.f32 %v1771_v13  ;;  %v474_v15 = vadd.f32 -0.16666655, %v470_v56 }
  0xbd   : > { %v340_v7 = vadd.f32 0.041666646, %v336_v1  ;;  %v316_v11 = vmul.f32 %v312_v51, %v296_v0  ;;  %v343_v10 = vmul.f32 %v339_v52, %v1797_v45  ;;  %v1466_v16 = vtrunc.f32 %v1804_v62 }
  0xbe   : > { %v484_v37 = vmul.f32 %v480_v63, %v1812_v6  ;;  %v352_v38 = vmul.f32 0.5, %v296_v0  ;;  %v1874_v53 = vand.u32 1, %v363_v59  ;;  %v1877_v12 = vadd.f32 %v322_v58, %v1810_v4 }
  0xbf   : > { %v344_v39 = vmul.f32 %v340_v7, %v296_v0  ;;  %v1880_v44 = vadd.f32 %v319_v2, %v1782_v36  ;;  %v347_v13 = vmul.f32 %v343_v10, %v1797_v45  ;;  %v1883_v46 = vand.u32 1, %v364_v61 }
  0xc0   : > { %v320_v48 = vmul.f32 %v316_v11, %v1833_v50  ;;  %vm1886_vm0 = vcmp.ge.s32.totalorder %v363_v59, 2  ;;  %v461_v63 = vmul.f32 -0.00019515296, %v1856_v43  ;;  %v478_v56 = vmul.f32 %v474_v15, %v1847_v3 }
  0xc1   : > { %v348_v49 = vmul.f32 %v344_v39, %v296_v0  ;;  %v355_v4 = vsub.f32 %v347_v13, %v351_v9  ;;  %v489_v58 = vmul.f32 2.4433157e-05, %v1856_v43  ;;  %v490_v36 = vmul.f32 2.4433157e-05, %v1847_v3 }
  0xc2   : > { %vm371_vm3 = vcmp.eq.s32.totalorder %v1874_v53, 1  ;;  %v1465_v45 = vcvt.f32.s32 %v1464_v5  ;;  %v465_v51 = vadd.f32 0.008332161, %v461_v63  ;;  %vm1897_vm4 = vcmp.ge.s32.totalorder %v364_v61, 2 }
  0xc3   : > { %v356_v1 = vsub.f32 %v348_v49, %v352_v38  ;;  %v1895_v2 = vadd.f32 1.0, %v355_v4  ;;  %v493_v59 = vadd.f32 -0.0013887316, %v489_v58  ;;  %v494_v52 = vadd.f32 -0.0013887316, %v490_v36  ;;  %vm379_vm6 = vmxor %vm371_vm3, %vm1886_vm0 }
  0xc4   : > { %v1902_v7 = vadd.f32 %v320_v48, %v1833_v50  ;;  %v1467_v11 = vcvt.f32.s32 %v1466_v16  ;;  %v469_v15 = vmul.f32 %v465_v51, %v1856_v43  ;;  %vm372_vm5 = vcmp.eq.s32.totalorder %v1883_v46, 1 }
  0xc5   : > { %v1904_v9 = vadd.f32 1.0, %v356_v1  ;;  %v395_v61 = vsel %vm371_vm3, %v1880_v44, %v1895_v2  ;;  %v497_v5 = vmul.f32 %v493_v59, %v1856_v43  ;;  %v498_v10 = vmul.f32 %v494_v52, %v1847_v3  ;;  %vm380_vm7 = vmxor %vm372_vm5, %vm1897_vm4 }
  0xc6   : > { %v399_v39 = vsub.f32 0.0, %v395_v61  ;;  %v473_v16 = vadd.f32 -0.16666655, %v469_v15  ;;  %v525_v38 = vand.u32 3, %v1465_v45  ;;  %v1460_v63 = vtrunc.f32 %v1753_v54 }
  0xc7   : > { %v396_v50 = vsel %vm372_vm5, %v1902_v7, %v1904_v9  ;;  %v501_v48 = vadd.f32 0.041666646, %v497_v5  ;;  %v502_v49 = vadd.f32 0.041666646, %v498_v10  ;;  %v482_v4 = vmul.f32 %v478_v56, %v1837_v60 }
  0xc8   : > { %v400_v13 = vsub.f32 0.0, %v396_v50  ;;  %v477_v58 = vmul.f32 %v473_v16, %v1856_v43  ;;  %v513_v36 = vmul.f32 0.5, %v1856_v43  ;;  %v526_v1 = vand.u32 3, %v1467_v11 }
  0xc9   : > { %v403_v45 = vsel %vm379_vm6, %v399_v39, %v395_v61  ;;  %v505_v59 = vmul.f32 %v501_v48, %v1856_v43  ;;  %v506_v52 = vmul.f32 %v502_v49, %v1847_v3  ;;  %v514_v56 = vmul.f32 0.5, %v1847_v3 }
  0xca   : > { %v404_v51 = vsel %vm380_vm7, %v400_v13, %v396_v50  ;;  %v481_v54 = vmul.f32 %v477_v58, %v1835_v57  ;;  %v1934_v5 = vand.u32 1, %v525_v38  ;;  %v1461_v33 = vcvt.f32.s32 %v1460_v63 }
  0xcb   : > { %v1408_v15 = vpack.c.bf16 %v404_v51, %v403_v45  ;;  %v509_v10 = vmul.f32 %v505_v59, %v1856_v43  ;;  %v510_v16 = vmul.f32 %v506_v52, %v1847_v3  ;;  %v1462_v11 = vtrunc.f32 %v1774_v20 }
  0xcc   : > { %v1940_v61 = vadd.f32 %v484_v37, %v1812_v6  ;;  %v1942_v50 = vand.u32 1, %v526_v1  ;;  %v329_v39 = vmul.f32 2.4433157e-05, %v1787_v40  ;;  %v330_v13 = vmul.f32 2.4433157e-05, %v1819_v41 }
  0xcd   : > { %1409 = vmatprep.subr.bf16.mxu0 %v1408_v15  ;;  %v1947_v48 = vadd.f32 %v482_v4, %v1837_v60  ;;  %v517_v49 = vsub.f32 %v509_v10, %v513_v36  ;;  %v518_v43 = vsub.f32 %v510_v16, %v514_v56  ;;  %v1463_v3 = vcvt.f32.s32 %v1462_v11 }
  0xce   : > { %1411 = vmatpush3.bf16.msra.mxu0 %v1408_v15  ;;  %vm533_vm8 = vcmp.eq.s32.totalorder %v1934_v5, 1  ;;  %vm1950_vm9 = vcmp.ge.s32.totalorder %v525_v38, 2  ;;  %v333_v6 = vadd.f32 -0.0013887316, %v329_v39  ;;  %v334_v37 = vadd.f32 -0.0013887316, %v330_v13 }
  0xcf   : > { %v1955_v63 = vadd.f32 %v481_v54, %v1835_v57  ;;  %v1957_v58 = vadd.f32 1.0, %v517_v49  ;;  %v1959_v45 = vadd.f32 1.0, %v518_v43  ;;  %v365_v60 = vand.u32 3, %v1461_v33  ;;  %vm541_vm12 = vmxor %vm533_vm8, %vm1950_vm9 }
  0xd0   : > { %vm534_vm10 = vcmp.eq.s32.totalorder %v1942_v50, 1  ;;  %vm1962_vm11 = vcmp.ge.s32.totalorder %v526_v1, 2  ;;  %v337_v38 = vmul.f32 %v333_v6, %v1787_v40  ;;  %v338_v36 = vmul.f32 %v334_v37, %v1819_v41 }
  0xd1   : > { %v557_v57 = vsel %vm533_vm8, %v1955_v63, %v1957_v58  ;;  %v558_v33 = vsel %vm534_vm10, %v1947_v48, %v1959_v45  ;;  %v366_v51 = vand.u32 3, %v1463_v3  ;;  %v1468_v1 = vtrunc.f32 %v1755_v55  ;;  %vm542_vm13 = vmxor %vm534_vm10, %vm1962_vm11 }
  0xd2   : > { %v561_v59 = vsub.f32 0.0, %v557_v57  ;;  %v562_v52 = vsub.f32 0.0, %v558_v33  ;;  %v341_v15 = vadd.f32 0.041666646, %v337_v38  ;;  %v342_v54 = vadd.f32 0.041666646, %v338_v36 }
  0xd3   : > { %v1987_v56 = vadd.f32 %v1859_v47, %v1776_v23  ;;  %v353_v55 = vmul.f32 0.5, %v1787_v40  ;;  %v369_v10 = vand.u32 1, %v365_v60  ;;  %v1470_v16 = vtrunc.f32 %v1780_v35 }
  0xd4   : > { %v565_v11 = vsel %vm541_vm12, %v561_v59, %v557_v57  ;;  %v566_v39 = vsel %vm542_vm13, %v562_v52, %v558_v33  ;;  %v345_v13 = vmul.f32 %v341_v15, %v1787_v40  ;;  %v346_v49 = vmul.f32 %v342_v54, %v1819_v41 }
  0xd5   : > { %v1424_v43 = vpack.c.bf16 %v566_v39, %v565_v11  ;;  %v354_v3 = vmul.f32 0.5, %v1819_v41  ;;  %v491_v6 = vmul.f32 2.4433157e-05, %v1791_v42  ;;  %v492_v37 = vmul.f32 2.4433157e-05, %v1824_v14 }
  0xd6   : > { %v349_v23 = vmul.f32 %v345_v13, %v1787_v40  ;;  %v350_v47 = vmul.f32 %v346_v49, %v1819_v41  ;;  %v370_v38 = vand.u32 1, %v366_v51  ;;  %v1469_v36 = vcvt.f32.s32 %v1468_v1 }
  0xd7   : > { %1425 = vmatprep.subr.bf16.mxu1 %v1424_v43  ;;  %vm1998_vm14 = vcmp.ge.s32.totalorder %v365_v60, 2  ;;  %v1471_v57 = vcvt.f32.s32 %v1470_v16  ;;  %v495_v33 = vadd.f32 -0.0013887316, %v491_v6  ;;  %v496_v59 = vadd.f32 -0.0013887316, %v492_v37 }
  0xd8   : > { %1427 = vmatpush3.bf16.msra.mxu1 %v1424_v43  ;;  %v357_v52 = vsub.f32 %v349_v23, %v353_v55  ;;  %v358_v15 = vsub.f32 %v350_v47, %v354_v3  ;;  %vm373_vm15 = vcmp.eq.s32.totalorder %v369_v10, 1  ;;  %vm2002_vm2 = vcmp.ge.s32.totalorder %v366_v51, 2 }
  0xd9   : > { %v499_v40 = vmul.f32 %v495_v33, %v1791_v42  ;;  %v500_v41 = vmul.f32 %v496_v59, %v1824_v14  ;;  %v383_v60 = vsel %vm371_vm3, %v1895_v2, %v1880_v44  ;;  %v384_v1 = vsel %vm372_vm5, %v1904_v9, %v1902_v7  ;;  %vm381_vm3 = vmxor %vm373_vm15, %vm1998_vm14 }
  0xda   : > { %v361_v55 = vadd.f32 1.0, %v357_v52  ;;  %v362_v16 = vadd.f32 1.0, %v358_v15  ;;  %vm374_vm6 = vcmp.eq.s32.totalorder %v370_v38, 1  ;;  %v527_v51 = vand.u32 3, %v1469_v36 }
  0xdb   : > { %v487_v11 = vadd.f32 %v1867_v8, %v1778_v34  ;;  %v503_v39 = vadd.f32 0.041666646, %v499_v40  ;;  %v504_v13 = vadd.f32 0.041666646, %v500_v41  ;;  %v528_v49 = vand.u32 3, %v1471_v57  ;;  %vm382_vm5 = vmxor %vm374_vm6, %vm2002_vm2 }
  0xdc   : > { %v397_v43 = vsel %vm373_vm15, %v1987_v56, %v361_v55  ;;  %v398_v53 = vsel %vm374_vm6, %v1877_v12, %v362_v16  ;;  %v387_v44 = vsub.f32 0.0, %v383_v60  ;;  %v388_v2 = vsub.f32 0.0, %v384_v1 }
  0xdd   : > { %v401_v46 = vsub.f32 0.0, %v397_v43  ;;  %v402_v7 = vsub.f32 0.0, %v398_v53  ;;  %v507_v9 = vmul.f32 %v503_v39, %v1791_v42  ;;  %v508_v34 = vmul.f32 %v504_v13, %v1824_v14 }
  0xde   : > { %v515_v8 = vmul.f32 0.5, %v1791_v42  ;;  %v516_v3 = vmul.f32 0.5, %v1824_v14  ;;  %v531_v6 = vand.u32 1, %v527_v51  ;;  %v392_v37 = vsel %vm1897_vm4, %v388_v2, %v384_v1 }
  0xdf   : > { %v405_v23 = vsel %vm381_vm3, %v401_v46, %v397_v43  ;;  %v406_v47 = vsel %vm382_vm5, %v402_v7, %v398_v53  ;;  %v511_v36 = vmul.f32 %v507_v9, %v1791_v42  ;;  %v512_v57 = vmul.f32 %v508_v34, %v1824_v14 }
  0xe0   : > { %v1412_v33 = vpack.c.bf16 %v406_v47, %v405_v23  ;;  %v532_v59 = vand.u32 1, %v528_v49  ;;  %v391_v52 = vsel %vm1886_vm0, %v387_v44, %v383_v60  ;;  %v546_v15 = vsel %vm534_vm10, %v1959_v45, %v1947_v48 }
  0xe1   : > { %v519_v40 = vsub.f32 %v511_v36, %v515_v8  ;;  %v520_v41 = vsub.f32 %v512_v57, %v516_v3  ;;  %v385_v0 = vsel %vm373_vm15, %v361_v55, %v1987_v56  ;;  %v386_v42 = vsel %vm374_vm6, %v362_v16, %v1877_v12 }
  0xe2   : > { %1413 = vmatprep.subr.bf16.mxu0 %v1412_v33  ;;  %v1416_v14 = vpack.c.bf16 %v392_v37, %v391_v52  ;;  %v545_v62 = vsel %vm533_vm8, %v1957_v58, %v1955_v63  ;;  %v389_v60 = vsub.f32 0.0, %v385_v0  ;;  %v390_v1 = vsub.f32 0.0, %v386_v42 }
  0xe3   : > { %v523_v39 = vadd.f32 1.0, %v519_v40  ;;  %v524_v50 = vadd.f32 1.0, %v520_v41  ;;  %vm535_vm0 = vcmp.eq.s32.totalorder %v531_v6, 1  ;;  %vm2050_vm4 = vcmp.ge.s32.totalorder %v527_v51, 2  ;;  %1415 = vmatpush3.bf16.msra.mxu0 %v1412_v33 }
  0xe4   : > { %vm536_vm7 = vcmp.eq.s32.totalorder %v532_v59, 1  ;;  %vm2054_vm10 = vcmp.ge.s32.totalorder %v528_v49, 2  ;;  %1417 = vmatprep.subr.bf16.mxu0 %v1416_v14  ;;  %v550_v45 = vsub.f32 0.0, %v546_v15  ;;  %v394_v5 = vsel %vm2002_vm2, %v390_v1, %v386_v42  ;;  %vm543_vm8 = vmxor %vm535_vm0, %vm2050_vm4 }
  0xe5   : > { %v559_v63 = vsel %vm535_vm0, %v487_v11, %v523_v39  ;;  %v560_v58 = vsel %vm536_vm7, %v1940_v61, %v524_v50  ;;  %v549_v56 = vsub.f32 0.0, %v545_v62  ;;  %v393_v10 = vsel %vm1998_vm14, %v389_v60, %v385_v0  ;;  %vm544_vm12 = vmxor %vm536_vm7, %vm2054_vm10 }
  0xe6   : > { %v563_v38 = vsub.f32 0.0, %v559_v63  ;;  %v564_v55 = vsub.f32 0.0, %v560_v58  ;;  %1337 = vmatmul.mubr.msk.f32.vlgmr.msra.gmra.mrb[0].mxu0 %vm630_vm1, %v1707_v17  ;;  %v1420_v54 = vpack.c.bf16 %v394_v5, %v393_v10  ;;  %v548_v16 = vsel %vm536_vm7, %v524_v50, %v1940_v61 }
  0xe7   : > { %1419 = vmatpush3.bf16.msra.mxu0 %v1416_v14  ;;  %v547_v35 = vsel %vm535_vm0, %v523_v39, %v487_v11  ;;  %1339 = vmatprep.mubr.msk.f32.mxu0 %vm630_vm1, %v1709_v18  ;;  %v554_v49 = vsel %vm1962_vm11, %v550_v45, %v546_v15  ;;  %v552_v43 = vsub.f32 0.0, %v548_v16  ;;  %v553_v61 = vsel %vm1950_vm9, %v549_v56, %v545_v62 }
  0xe8   : > { %v567_v51 = vsel %vm543_vm8, %v563_v38, %v559_v63  ;;  %v568_v13 = vsel %vm544_vm12, %v564_v55, %v560_v58  ;;  %1421 = vmatprep.subr.bf16.mxu0 %v1420_v54  ;;  %v551_v44 = vsub.f32 0.0, %v547_v35  ;;  %v1432_v11 = vpack.c.bf16 %v554_v49, %v553_v61 }
  0xe9   : > { %v1428_v53 = vpack.c.bf16 %v568_v13, %v567_v51  ;;  %v556_v2 = vsel %vm2054_vm10, %v552_v43, %v548_v16 }
  0xea   : > { %1340 = vmatmul.mubr.msk.f32.gmra.mrb[2].mxu0 %vm630_vm1, %v1711_v19  ;;  %v555_v4 = vsel %vm2050_vm4, %v551_v44, %v547_v35 }
  0xeb   : > { %1429 = vmatprep.subr.bf16.mxu1 %v1428_v53  ;;  %1423 = vmatpush3.bf16.msra.mxu0 %v1420_v54  ;;  %v1436_v20 = vpack.c.bf16 %v556_v2, %v555_v4 }
  0xec   : > { %1431 = vmatpush3.bf16.msra.mxu1 %v1428_v53  ;;  %1342 = vmatprep.mubr.msk.f32.mxu0 %vm630_vm1, %v1715_v21 }
  0xed   : > { %1433 = vmatprep.subr.bf16.mxu1 %v1432_v11 }
  0xee   : > { %1343 = vmatmul.mubr.msk.f32.gmra.mrb[4].mxu0 %vm630_vm1, %v1717_v22 }
  0xef   : > { %1377 = vmatmul.mubr.msk.f32.vlgmr.msra.gmra.mrb[0].mxu1 %vm630_vm1, %v1707_v17  ;;  %1345 = vmatprep.mubr.msk.f32.mxu0 %vm630_vm1, %v1719_v24  ;;  %v2244_v17 = vld [vmem:[#allocation5_spill] sm:$0xff] }
  0xf0   : > { %1435 = vmatpush3.bf16.msra.mxu1 %v1432_v11  ;;  %1379 = vmatprep.mubr.msk.f32.mxu1 %vm630_vm1, %v1709_v18 }
  0xf1   : > { %1437 = vmatprep.subr.bf16.mxu1 %v1436_v20 }
  0xf2   : > { %1346 = vmatmul.mubr.msk.f32.gmra.mrb[6].mxu0 %vm630_vm1, %v1721_v25 }
  0xf3   : > { %1380 = vmatmul.mubr.msk.f32.gmra.mrb[2].mxu1 %vm630_vm1, %v1711_v19  ;;  %1356 = vmatprep.mubr.msk.f32.mxu0 %vm630_vm1, %v1723_v26 }
  0xf4   : > { %1439 = vmatpush3.bf16.msra.mxu1 %v1436_v20  ;;  %1382 = vmatprep.mubr.msk.f32.mxu1 %vm630_vm1, %v1715_v21 }
  0xf6   : > { %1357 = vmatmul.mubr.msk.f32.vlgmr.msra.gmra.mrb[0].mxu0 %vm630_vm1, %v1726_v27 }
  0xf7   : > { %1383 = vmatmul.mubr.msk.f32.gmra.mrb[4].mxu1 %vm630_vm1, %v1717_v22  ;;  %1359 = vmatprep.mubr.msk.f32.mxu0 %vm630_vm1, %v1728_v28 }
  0xf8   : > { %1385 = vmatprep.mubr.msk.f32.mxu1 %vm630_vm1, %v1719_v24 }
  0xfa   : > { %1360 = vmatmul.mubr.msk.f32.gmra.mrb[2].mxu0 %vm630_vm1, %v1730_v29 }
  0xfb   : > { %1386 = vmatmul.mubr.msk.f32.gmra.mrb[6].mxu1 %vm630_vm1, %v1721_v25  ;;  %1362 = vmatprep.mubr.msk.f32.mxu0 %vm630_vm1, %v1732_v30 }
  0xfc   : > { %1396 = vmatprep.mubr.msk.f32.mxu1 %vm630_vm1, %v1723_v26 }
  0xfe   : > { %1363 = vmatmul.mubr.msk.f32.gmra.mrb[4].mxu0 %vm630_vm1, %v1734_v31 }
  0xff   : > { %1397 = vmatmul.mubr.msk.f32.vlgmr.msra.gmra.mrb[0].mxu1 %vm630_vm1, %v1726_v27  ;;  %1365 = vmatprep.mubr.msk.f32.mxu0 %vm630_vm1, %v1737_v32 }
 0x100   : > { %1399 = vmatprep.mubr.msk.f32.mxu1 %vm630_vm1, %v1728_v28 }
 0x102   : > { %1366 = vmatmul.mubr.msk.f32.gmra.mrb[6].mxu0 %vm630_vm1, %v2244_v17 }
 0x103   : > { %1400 = vmatmul.mubr.msk.f32.gmra.mrb[2].mxu1 %vm630_vm1, %v1730_v29 }
 0x104   : > { %1402 = vmatprep.mubr.msk.f32.mxu1 %vm630_vm1, %v1732_v30 }
 0x107   : > { %1403 = vmatmul.mubr.msk.f32.gmra.mrb[4].mxu1 %vm630_vm1, %v1734_v31 }
 0x108   : > { %1405 = vmatprep.mubr.msk.f32.mxu1 %vm630_vm1, %v1737_v32 }
 0x10b   : > { %1406 = vmatmul.mubr.msk.f32.gmra.mrb[6].mxu1 %vm630_vm1, %v2244_v17 }
 0x1c9   : > { %v1358_v18 = vpop.f32.mrb[0].mxu0 }
 0x1ca   : > { %1100 = vst [vmem:[%s2145_s26 + $0x8] sm:$0xff] %v1358_v18  ;;  %v850_v19 = vpop.f32.mrb[1].mxu0 }
 0x1cb   : > { %1099 = vst [vmem:[%s2145_s26] sm:$0xff] %v850_v19 }
 0x1cd   : > { %v1361_v21 = vpop.f32.mrb[2].mxu0 }
 0x1ce   : > { %1102 = vst [vmem:[%s2145_s26 + $0x18] sm:$0xff] %v1361_v21  ;;  %v860_v22 = vpop.f32.mrb[3].mxu0 }
 0x1cf   : > { %1101 = vst [vmem:[%s2145_s26 + $0x10] sm:$0xff] %v860_v22 }
 0x1d1   : > { %v1364_v24 = vpop.f32.mrb[4].mxu0 }
 0x1d2   : > { %v1398_v25 = vpop.f32.mrb[0].mxu1  ;;  %1104 = vst [vmem:[%s2145_s26 + $0x28] sm:$0xff] %v1364_v24  ;;  %v870_v26 = vpop.f32.mrb[5].mxu0 }
 0x1d3   : > { %1108 = vst [vmem:[%s2145_s26 + $0x48] sm:$0xff] %v1398_v25  ;;  %v1060_v27 = vpop.f32.mrb[1].mxu1  ;;  %1103 = vst [vmem:[%s2145_s26 + $0x20] sm:$0xff] %v870_v26 }
 0x1d4   : > { %1107 = vst [vmem:[%s2145_s26 + $0x40] sm:$0xff] %v1060_v27 }
 0x1d5   : > { %v1367_v28 = vpop.f32.mrb[6].mxu0 }
 0x1d6   : > { %v1401_v29 = vpop.f32.mrb[2].mxu1  ;;  %1106 = vst [vmem:[%s2145_s26 + $0x38] sm:$0xff] %v1367_v28  ;;  %v880_v30 = vpop.f32.mrb[7].mxu0 }
 0x1d7   : > { %1110 = vst [vmem:[%s2145_s26 + $0x58] sm:$0xff] %v1401_v29  ;;  %v1070_v31 = vpop.f32.mrb[3].mxu1  ;;  %1105 = vst [vmem:[%s2145_s26 + $0x30] sm:$0xff] %v880_v30 }
 0x1d8   : > { %1109 = vst [vmem:[%s2145_s26 + $0x50] sm:$0xff] %v1070_v31 }
 0x1da   : > { %v1404_v32 = vpop.f32.mrb[4].mxu1 }
 0x1db   : > { %1112 = vst [vmem:[%s2145_s26 + $0x68] sm:$0xff] %v1404_v32  ;;  %v1080_v46 = vpop.f32.mrb[5].mxu1 }
 0x1dc   : > { %1111 = vst [vmem:[%s2145_s26 + $0x60] sm:$0xff] %v1080_v46 }
 0x1de   : > { %v1407_v7 = vpop.f32.mrb[6].mxu1 }
 0x1df   : > { %1114 = vst [vmem:[%s2145_s26 + $0x78] sm:$0xff] %v1407_v7  ;;  %v1090_v9 = vpop.f32.mrb[7].mxu1 }
 0x1e0   : > { %1113 = vst [vmem:[%s2145_s26 + $0x70] sm:$0xff] %v1090_v9 }
 0x1e1   : > { %1547 = shalt.err (!%p1544_p5)
}
 0x1e2   : > { %s1548_s9 = scalar_lea.hbm %s2166_s4, 2048  ;;  %s1552_s18 = scalar_lea.hbm %s2223_s3, 4096 }
 0x1e3   : > { %p1549_p6 = scmp.ne.s32.totalorder %s2166_s4, %s1548_s9  ;;  %p1553_p10 = scmp.lt.u32.totalorder %s2166_s4, %s2223_s3 }
 0x1e4   : > { %p1554_p11 = scmp.lt.u32.totalorder %s1552_s18, %s1548_s9  ;;  %p1556_p13 = scmp.lt.u32.totalorder %s1548_s9, %s2166_s4 }
 0x1e5   : > { %p1550_p7 = pnand %p1549_p6, %p1680_p4 }
 0x1e6   : > { %p1555_p12 = por %p1554_p11, %p1553_p10 }
 0x1e7   : > { %p1551_p9 = pneg %p1550_p7 }
 0x1e8   : > { %p1557_p0 = por %p1556_p13, %p1555_p12 }
 0x1ea   : > { %p1558_p1 = pnand %p1557_p0, %p1551_p9 }
 0x1ec   : > { %1561 = shalt.err (!%p1558_p1)
}
 0x1ed   : > { %s1617_s23 = smov 128   ;;  %s1618_s26 = smov 256  }
 0x1ee   : > { %s1619_s27 = smov 8  }
 0x1ef   : > { %1472 = dma.vmem_to_hbm [thread:$0]  (%p1680_p4), %s2168_s28, 2048, %s2166_s4, %s2174_s15, %s1617_s23, %s1618_s26, %s1619_s27  }
 0x1f0 PF: > { %p1478_p2 = scmp.ge.s32.totalorder %s1612_s17, 2  ;;  %s1145_s29 = sand.u32 1, %s1592_s12  }
 0x1f1   : > { %s1146_s30 = scalar_lea.sflag [#allocation3], %s1145_s29 }
 0x1f2   : > { %p1475_p3 = pnand %p1478_p2, %p1687_p8 }
 0x1f4   : > { %1587 = dma.done.wait (!%p1475_p3), %s1146_s30, 2048  }
 0x1f5   : > { %1589 = vsyncadd (!%p1475_p3), %s1146_s30, 4294965248  ;;  %s16_s17 = sadd.s32 1, %s1612_s17   ;;  %s2245_s12 = smov %s1596_s13 }
 0x1f6   : > { %p13_p5 = scmp.ge.s32.totalorder %s16_s17, 4   ;;  %s2246_s13 = smov %s1600_s14 }
 0x1f7   : > { %s2247_s14 = smov %s1693_s25  ;;  %s2248_s15 = smov %s1608_s16 }
 0x1f8   : > { %s2249_s16 = smov %s2251_s20  ;;  %15 = sbr.rel (!%p13_p5) target bundleno = 4 (0x4), region = 70 }
 0x1ff   :  { %1151 = vsyncpa [#allocation3], 1 }
 0x200   :  { %1153 = vsyncpa [#allocation3 + $0x1], 1 }

</bundles_post_ra>
